<compile_context>
chip_gen: v6e
topology: v6e:2x2x1
jax: 0.10.0
libtpu: 0.0.40
codegen_flags: <defaults>
</compile_context>

<pallas_src>
import functools

import jax
import jax.numpy as jnp
from jax.experimental import pallas as pl
from jax.experimental.pallas import tpu as pltpu

LANE = 128  # TPU lane width: make every feature dim a multiple of this.


def _round_up(n, m):
    return ((n + m - 1) // m) * m


def _mlp_kernel(n_layers, out_dim, x_ref, *refs):
    """Fused MLP: (Linear -> ReLU) * (n_layers-1), Linear, log_softmax(dim=1).

    refs = (w0_aug, w1_aug, ..., w_out_aug, out_ref)
    Each w_aug is [in_pad, out_pad] with the bias folded into the last row and
    a 1.0 at [-1, -1] so the activation's "ones lane" propagates through ReLU.
    """
    out_ref = refs[-1]
    ws = refs[:-1]

    h = x_ref[...]  # already f32; no redundant cast
    for i in range(n_layers - 1):
        h = jnp.maximum(
            jnp.dot(h, ws[i][...], preferred_element_type=jnp.float32), 0.0
        )

    z = jnp.dot(h, ws[-1][...], preferred_element_type=jnp.float32)

    # Mask padded output lanes to -inf so they do not affect max / sum-exp.
    col = jax.lax.broadcasted_iota(jnp.int32, z.shape, 1)
    z = jnp.where(col < out_dim, z, jnp.float32(-jnp.inf))

    # Numerically stable log_softmax over dim=1.
    m = jnp.max(z, axis=1, keepdims=True)
    s = z - m
    lse = jnp.log(jnp.sum(jnp.exp(s), axis=1, keepdims=True))
    out_ref[...] = s - lse


def _augment_params(weights, biases):
    """Fold bias into weight and pad to lane-dense [in_pad, out_pad] tiles.

    Column `out_pad - 1` of each layer's output is a "ones lane":
    W_aug[in_pad - 1, out_pad - 1] = 1 and the input's last column is 1.0, so
    the bias row (W_aug[in_pad - 1, :out_dim]) is added exactly like `+ b`.
    """
    aug = []
    for w, b in zip(weights, biases):
        in_dim, out_dim = w.shape
        in_pad = _round_up(in_dim + 1, LANE)
        out_pad = _round_up(out_dim + 1, LANE)
        wa = jnp.zeros((in_pad, out_pad), jnp.float32)
        wa = wa.at[:in_dim, :out_dim].set(w)
        wa = wa.at[in_pad - 1, :out_dim].set(b.reshape(-1))
        wa = wa.at[in_pad - 1, out_pad - 1].set(1.0)  # propagate the ones lane
        aug.append(wa)
    return aug


@jax.jit
def neural_network_forward(x, weights, biases):
    """weights: list of [in, out] arrays; biases: list of [1, out] arrays.
    Last (weight, bias) pair is the output layer; the rest are hidden layers."""
    n_layers = len(weights)
    out_dim = weights[-1].shape[1]
    batch, in_dim = x.shape

    aug_ws = _augment_params(weights, biases)
    in_pad = aug_ws[0].shape[0]
    out_pad = aug_ws[-1].shape[1]

    # Batch tiling: sublane-aligned tile, capped at 256 rows per grid step.
    tb = min(256, _round_up(batch, 8))
    batch_pad = _round_up(batch, tb)

    # Lane-dense padded input with the ones lane set to 1.0.
    xp = jnp.zeros((batch_pad, in_pad), jnp.float32)
    xp = xp.at[:batch, :in_dim].set(x)
    xp = xp.at[:, in_pad - 1].set(1.0)

    kernel = functools.partial(_mlp_kernel, n_layers, out_dim)

    x_spec = pl.BlockSpec((tb, in_pad), lambda i: (i, 0))
    # Constant index_map -> weights DMA'd once, resident across grid steps.
    w_specs = [pl.BlockSpec(w.shape, lambda i: (0, 0)) for w in aug_ws]
    out_spec = pl.BlockSpec((tb, out_pad), lambda i: (i, 0))

    flops = 2 * batch_pad * sum(w.shape[0] * w.shape[1] for w in aug_ws)
    bytes_accessed = (
        xp.size * 4
        + sum(w.size * 4 for w in aug_ws)
        + batch_pad * out_pad * 4
    )
    transcendentals = batch_pad * out_pad  # exp in log_softmax

    out_padded = pl.pallas_call(
        kernel,
        out_shape=jax.ShapeDtypeStruct((batch_pad, out_pad), jnp.float32),
        grid=(batch_pad // tb,),
        in_specs=[x_spec] + w_specs,
        out_specs=out_spec,
        compiler_params=pltpu.CompilerParams(
            dimension_semantics=("parallel",),
            vmem_limit_bytes=32 * 1024 * 1024,  # safe on v5e/v6e/v7x
        ),
        cost_estimate=pl.CostEstimate(
            flops=flops,
            transcendentals=transcendentals,
            bytes_accessed=bytes_accessed,
        ),
    )(xp, *aug_ws)

    # Slice back to the logical shape.
    return out_padded[:batch, :out_dim]


def init_params(key, input_size, output_size, hidden_layers):
    """Deterministic synthetic init matching the nn.Module layer shapes."""
    sizes = [input_size] + list(hidden_layers) + [output_size]
    weights, biases = [], []
    for i in range(len(sizes) - 1):
        key, wk, bk = jax.random.split(key, 3)
        fan_in, fan_out = sizes[i], sizes[i + 1]
        weights.append(
            jax.random.normal(wk, (fan_in, fan_out), jnp.float32) * 0.1
        )
        biases.append(
            jax.random.normal(bk, (1, fan_out), jnp.float32) * 0.01
        )
    return weights, biases


def _reference_forward(x, weights, biases):
    """Pure-JAX reference of the PyTorch module's forward."""
    h = x
    for w, b in zip(weights[:-1], biases[:-1]):
        h = jnp.maximum(h @ w + b, 0.0)
    z = h @ weights[-1] + biases[-1]
    return jax.nn.log_softmax(z, axis=1)


if __name__ == "__main__":
    # NeuralNetwork(input_size=32, output_size=10, hidden_layers=[64, 48])
    input_size, output_size = 32, 10
    hidden_layers = [64, 48]
    batch = 8

    key = jax.random.PRNGKey(0)
    key, xk = jax.random.split(key)
    x = jax.random.normal(xk, (batch, input_size), jnp.float32)

    weights, biases = init_params(key, input_size, output_size, hidden_layers)

    out = neural_network_forward(x, weights, biases)
    out = jax.block_until_ready(out)

    assert out.shape == (batch, output_size)
    # log_softmax rows should (approximately) exponentiate-sum to 1.
    assert bool(jnp.allclose(jnp.sum(jnp.exp(out), axis=1), 1.0, atol=1e-4))
    # Match the pure-JAX reference (MXU default-precision tolerance).
    ref = _reference_forward(x, weights, biases)
    assert bool(jnp.allclose(out, ref, atol=1e-2, rtol=1e-2))
    print("KERNEL_OK")
</pallas_src>

<mosaic_0001>
module attributes {stable_mosaic.version = 11 : i64} {
  func.func @_mlp_kernel(%arg0: i32, %arg1: memref<8x128xf32, #tpu.memory_space<vmem>>, %arg2: memref<128x128xf32, #tpu.memory_space<vmem>>, %arg3: memref<128x128xf32, #tpu.memory_space<vmem>>, %arg4: memref<128x128xf32, #tpu.memory_space<vmem>>, %arg5: memref<8x128xf32, #tpu.memory_space<vmem>>) attributes {dimension_semantics = [#tpu.dimension_semantics<parallel>], iteration_bounds = array<i64: 1>, scalar_prefetch = 0 : i64, scratch_operands = 0 : i64, tpu.core_type = #tpu.core_type<tc>, window_params = [{transform_indices = @transform_0, window_bounds = array<i64: 8, 128>}, {pipeline_mode = #tpu.pipeline_mode<synchronous>, transform_indices = @transform_1, window_bounds = array<i64: 128, 128>}, {pipeline_mode = #tpu.pipeline_mode<synchronous>, transform_indices = @transform_2, window_bounds = array<i64: 128, 128>}, {pipeline_mode = #tpu.pipeline_mode<synchronous>, transform_indices = @transform_3, window_bounds = array<i64: 128, 128>}, {transform_indices = @transform_4, window_bounds = array<i64: 8, 128>}]} {
    %c0 = arith.constant 0 : index
    %c0_0 = arith.constant 0 : index
    %0 = vector.load %arg1[%c0, %c0_0] : memref<8x128xf32, #tpu.memory_space<vmem>>, vector<8x128xf32>
    %c0_1 = arith.constant 0 : index
    %c0_2 = arith.constant 0 : index
    %1 = vector.load %arg2[%c0_1, %c0_2] : memref<128x128xf32, #tpu.memory_space<vmem>>, vector<128x128xf32>
    %cst = arith.constant dense<0.000000e+00> : vector<8x128xf32>
    %2 = tpu.matmul %0, %1, %cst {dimension_numbers = #tpu.dot_dimension_numbers<[1], [0], [0], [1], [0, 0, 1, 1], [], []>} : vector<8x128xf32>, vector<128x128xf32>, vector<8x128xf32> -> vector<8x128xf32>
    %cst_3 = arith.constant 0.000000e+00 : f32
    %3 = vector.broadcast %cst_3 : f32 to vector<8x128xf32>
    %4 = arith.maximumf %2, %3 : vector<8x128xf32>
    %c0_4 = arith.constant 0 : index
    %c0_5 = arith.constant 0 : index
    %5 = vector.load %arg3[%c0_4, %c0_5] : memref<128x128xf32, #tpu.memory_space<vmem>>, vector<128x128xf32>
    %cst_6 = arith.constant dense<0.000000e+00> : vector<8x128xf32>
    %6 = tpu.matmul %4, %5, %cst_6 {dimension_numbers = #tpu.dot_dimension_numbers<[1], [0], [0], [1], [0, 0, 1, 1], [], []>} : vector<8x128xf32>, vector<128x128xf32>, vector<8x128xf32> -> vector<8x128xf32>
    %cst_7 = arith.constant 0.000000e+00 : f32
    %7 = vector.broadcast %cst_7 : f32 to vector<8x128xf32>
    %8 = arith.maximumf %6, %7 : vector<8x128xf32>
    %c0_8 = arith.constant 0 : index
    %c0_9 = arith.constant 0 : index
    %9 = vector.load %arg4[%c0_8, %c0_9] : memref<128x128xf32, #tpu.memory_space<vmem>>, vector<128x128xf32>
    %cst_10 = arith.constant dense<0.000000e+00> : vector<8x128xf32>
    %10 = tpu.matmul %8, %9, %cst_10 {dimension_numbers = #tpu.dot_dimension_numbers<[1], [0], [0], [1], [0, 0, 1, 1], [], []>} : vector<8x128xf32>, vector<128x128xf32>, vector<8x128xf32> -> vector<8x128xf32>
    %11 = tpu.iota {dimensions = array<i32: 1>} : vector<8x128xi32>
    %c10_i32 = arith.constant 10 : i32
    %12 = vector.broadcast %c10_i32 : i32 to vector<8x128xi32>
    %13 = arith.cmpi slt, %11, %12 : vector<8x128xi32>
    %cst_11 = arith.constant 0xFF800000 : f32
    %14 = vector.broadcast %cst_11 : f32 to vector<8x128xf32>
    %15 = arith.select %13, %10, %14 : vector<8x128xi1>, vector<8x128xf32>
    %cst_12 = arith.constant dense<0xFF800000> : vector<8xf32>
    %16 = vector.multi_reduction <maximumf>, %15, %cst_12 [1] : vector<8x128xf32> to vector<8xf32>
    %17 = vector.shape_cast %16 : vector<8xf32> to vector<8x1xf32>
    %18 = vector.broadcast %17 : vector<8x1xf32> to vector<8x128xf32>
    %19 = arith.subf %15, %18 : vector<8x128xf32>
    %20 = math.exp %19 : vector<8x128xf32>
    %cst_13 = arith.constant dense<0.000000e+00> : vector<8xf32>
    %21 = vector.multi_reduction <add>, %20, %cst_13 [1] : vector<8x128xf32> to vector<8xf32>
    %22 = vector.shape_cast %21 : vector<8xf32> to vector<8x1xf32>
    %23 = math.log %22 : vector<8x1xf32>
    %24 = vector.broadcast %23 : vector<8x1xf32> to vector<8x128xf32>
    %25 = arith.subf %19, %24 : vector<8x128xf32>
    %c0_14 = arith.constant 0 : index
    %c0_15 = arith.constant 0 : index
    %26 = vector.load %arg5[%c0_14, %c0_15] : memref<8x128xf32, #tpu.memory_space<vmem>>, vector<8x128xf32>
    tpu.vector_store %arg5[%c0_14, %c0_15], %25 {strides = array<i32>} : memref<8x128xf32, #tpu.memory_space<vmem>>, vector<8x128xf32>,
    return
  }
  func.func @transform_0(%arg0: i32) -> (i32, i32) {
    %c0_i32 = arith.constant 0 : i32
    %c0_i32_0 = arith.constant 0 : i32
    return %arg0, %c0_i32 : i32, i32
  }
  func.func @transform_1(%arg0: i32) -> (i32, i32) {
    %c0_i32 = arith.constant 0 : i32
    %c0_i32_0 = arith.constant 0 : i32
    %c0_i32_1 = arith.constant 0 : i32
    return %c0_i32, %c0_i32_0 : i32, i32
  }
  func.func @transform_2(%arg0: i32) -> (i32, i32) {
    %c0_i32 = arith.constant 0 : i32
    %c0_i32_0 = arith.constant 0 : i32
    %c0_i32_1 = arith.constant 0 : i32
    return %c0_i32, %c0_i32_0 : i32, i32
  }
  func.func @transform_3(%arg0: i32) -> (i32, i32) {
    %c0_i32 = arith.constant 0 : i32
    %c0_i32_0 = arith.constant 0 : i32
    %c0_i32_1 = arith.constant 0 : i32
    return %c0_i32, %c0_i32_0 : i32, i32
  }
  func.func @transform_4(%arg0: i32) -> (i32, i32) {
    %c0_i32 = arith.constant 0 : i32
    %c0_i32_0 = arith.constant 0 : i32
    return %arg0, %c0_i32 : i32, i32
  }
}

</mosaic_0001>

<bundles_post_ra>
// kernel: neural_network_forward.1
= control target key start
LH: loop header
LB: loop body
LE: loop exit
PB: predicated region body
PF: predicated region fallthrough
CT: control target
= control target key end

     0   :  { %v493_v1 = vmov 0.0   ;;  %vm494_vm0 = vmmov 0   ;;  %s725_s0 = inlined_call_operand.vmem [shape: f32[8,128], index: 0, kind: input, shape index: {}]   ;;  %s726_s1 = inlined_call_operand.vmem [shape: f32[128,128], index: 1, kind: input, shape index: {}]   ;;  %s727_s2 = inlined_call_operand.vmem [shape: f32[128,128], index: 2, kind: input, shape index: {}]   ;;  %s728_s3 = inlined_call_operand.vmem [shape: f32[128,128], index: 3, kind: input, shape index: {}]   ;;  %s729_s4 = inlined_call_operand.hbm [shape: f32[8,128], index: 4, kind: output, shape index: {}]  }
   0x1   :  { %v34_v0 = vld [vmem:[%s726_s1 + $0x78] sm:$0xff]  ;;  %359 = vmatprep.subr.mxu0 %v493_v1  ;;  %v33_v2 = vld [vmem:[%s726_s1 + $0x70] sm:$0xff]  ;;  %391 = vmatprep.mubr.msk.f32.mxu0 %vm494_vm0, %v493_v1  ;;  %v32_v3 = vld [vmem:[%s726_s1 + $0x68] sm:$0xff] }
   0x2   :  { %360 = vmatpush3.msra.mxu0 %v34_v0  ;;  %394 = vmatprep.subr.mxu1 %v493_v1  ;;  %v31_v4 = vld [vmem:[%s726_s1 + $0x60] sm:$0xff]  ;;  %v121_v5 = vld [vmem:[%s727_s2 + $0x78] sm:$0xff]  ;;  %v120_v6 = vld [vmem:[%s727_s2 + $0x70] sm:$0xff] }
   0x3   :  { %361 = vmatprep.subr.mxu0 %v493_v1  ;;  %426 = vmatprep.mubr.msk.f32.mxu1 %vm494_vm0, %v493_v1  ;;  %v30_v7 = vld [vmem:[%s726_s1 + $0x58] sm:$0xff]  ;;  %v119_v8 = vld [vmem:[%s727_s2 + $0x68] sm:$0xff]  ;;  %v29_v9 = vld [vmem:[%s726_s1 + $0x50] sm:$0xff] }
   0x4   :  { %362 = vmatpush3.msra.mxu0 %v33_v2  ;;  %395 = vmatpush3.msra.mxu1 %v121_v5  ;;  %v118_v10 = vld [vmem:[%s727_s2 + $0x60] sm:$0xff] }
   0x5   :  { %363 = vmatprep.subr.mxu0 %v493_v1  ;;  %396 = vmatprep.subr.mxu1 %v493_v1 }
   0x6   :  { %364 = vmatpush3.msra.mxu0 %v32_v3  ;;  %397 = vmatpush3.msra.mxu1 %v120_v6 }
   0x7   :  { %365 = vmatprep.subr.mxu0 %v493_v1  ;;  %398 = vmatprep.subr.mxu1 %v493_v1 }
   0x8   :  { %366 = vmatpush3.msra.mxu0 %v31_v4  ;;  %399 = vmatpush3.msra.mxu1 %v119_v8 }
   0x9   :  { %367 = vmatprep.subr.mxu0 %v493_v1 }
   0xa   :  { %368 = vmatpush3.msra.mxu0 %v30_v7 }
   0xb   :  { %9 = vsyncpa [#allocation3], 0  ;;  %369 = vmatprep.subr.mxu0 %v493_v1  ;;  %v28_v11 = vld [vmem:[%s726_s1 + $0x48] sm:$0xff]  ;;  %400 = vmatprep.subr.mxu1 %v493_v1  ;;  %v117_v12 = vld [vmem:[%s727_s2 + $0x58] sm:$0xff]  ;;  %v279_v56 = vlaneseq }
   0xc   :  { %370 = vmatpush3.msra.mxu0 %v29_v9  ;;  %401 = vmatpush3.msra.mxu1 %v118_v10  ;;  %v27_v13 = vld [vmem:[%s726_s1 + $0x40] sm:$0xff]  ;;  %v116_v14 = vld [vmem:[%s727_s2 + $0x50] sm:$0xff]  ;;  %v26_v15 = vld [vmem:[%s726_s1 + $0x38] sm:$0xff] }
   0xd   :  { %371 = vmatprep.subr.mxu0 %v493_v1  ;;  %402 = vmatprep.subr.mxu1 %v493_v1  ;;  %v115_v16 = vld [vmem:[%s727_s2 + $0x48] sm:$0xff]  ;;  %v25_v17 = vld [vmem:[%s726_s1 + $0x30] sm:$0xff]  ;;  %v114_v18 = vld [vmem:[%s727_s2 + $0x40] sm:$0xff]  ;;  %v280_v57 = vand.u32 127, %v279_v56 }
   0xe   :  { %372 = vmatpush3.msra.mxu0 %v28_v11  ;;  %403 = vmatpush3.msra.mxu1 %v117_v12  ;;  %v24_v19 = vld [vmem:[%s726_s1 + $0x28] sm:$0xff]  ;;  %v113_v20 = vld [vmem:[%s727_s2 + $0x38] sm:$0xff]  ;;  %v23_v21 = vld [vmem:[%s726_s1 + $0x20] sm:$0xff] }
   0xf   :  { %373 = vmatprep.subr.mxu0 %v493_v1  ;;  %404 = vmatprep.subr.mxu1 %v493_v1  ;;  %v112_v22 = vld [vmem:[%s727_s2 + $0x30] sm:$0xff]  ;;  %v22_v23 = vld [vmem:[%s726_s1 + $0x18] sm:$0xff]  ;;  %v111_v24 = vld [vmem:[%s727_s2 + $0x28] sm:$0xff]  ;;  %vm281_vm1 = vcmp.lt.s32.totalorder %v280_v57, 10 }
  0x10   :  { %374 = vmatpush3.msra.mxu0 %v27_v13  ;;  %405 = vmatpush3.msra.mxu1 %v116_v14  ;;  %v21_v25 = vld [vmem:[%s726_s1 + $0x10] sm:$0xff]  ;;  %v110_v26 = vld [vmem:[%s727_s2 + $0x20] sm:$0xff]  ;;  %v20_v27 = vld [vmem:[%s726_s1 + $0x8] sm:$0xff] }
  0x11   :  { %375 = vmatprep.subr.mxu0 %v493_v1  ;;  %406 = vmatprep.subr.mxu1 %v493_v1  ;;  %v109_v28 = vld [vmem:[%s727_s2 + $0x18] sm:$0xff]  ;;  %v19_v29 = vld [vmem:[%s726_s1] sm:$0xff]  ;;  %v108_v30 = vld [vmem:[%s727_s2 + $0x10] sm:$0xff] }
  0x12   :  { %376 = vmatpush3.msra.mxu0 %v26_v15  ;;  %407 = vmatpush3.msra.mxu1 %v115_v16  ;;  %v18_v31 = vld [vmem:[%s725_s0] sm:$0xff]  ;;  %v107_v32 = vld [vmem:[%s727_s2 + $0x8] sm:$0xff]  ;;  %v208_v34 = vld [vmem:[%s728_s3 + $0x78] sm:$0xff] }
  0x13   :  { %377 = vmatprep.subr.mxu0 %v493_v1  ;;  %408 = vmatprep.subr.mxu1 %v493_v1  ;;  %v106_v33 = vld [vmem:[%s727_s2] sm:$0xff]  ;;  %v207_v35 = vld [vmem:[%s728_s3 + $0x70] sm:$0xff]  ;;  %v206_v36 = vld [vmem:[%s728_s3 + $0x68] sm:$0xff] }
  0x14   :  { %378 = vmatpush3.msra.mxu0 %v25_v17  ;;  %409 = vmatpush3.msra.mxu1 %v114_v18  ;;  %v205_v37 = vld [vmem:[%s728_s3 + $0x60] sm:$0xff]  ;;  %v204_v38 = vld [vmem:[%s728_s3 + $0x58] sm:$0xff]  ;;  %v203_v39 = vld [vmem:[%s728_s3 + $0x50] sm:$0xff] }
  0x15   :  { %379 = vmatprep.subr.mxu0 %v493_v1  ;;  %410 = vmatprep.subr.mxu1 %v493_v1  ;;  %v202_v40 = vld [vmem:[%s728_s3 + $0x48] sm:$0xff]  ;;  %v201_v41 = vld [vmem:[%s728_s3 + $0x40] sm:$0xff]  ;;  %v200_v42 = vld [vmem:[%s728_s3 + $0x38] sm:$0xff] }
  0x16   :  { %380 = vmatpush3.msra.mxu0 %v24_v19  ;;  %411 = vmatpush3.msra.mxu1 %v113_v20  ;;  %v199_v43 = vld [vmem:[%s728_s3 + $0x30] sm:$0xff]  ;;  %v198_v44 = vld [vmem:[%s728_s3 + $0x28] sm:$0xff]  ;;  %v197_v45 = vld [vmem:[%s728_s3 + $0x20] sm:$0xff] }
  0x17   :  { %381 = vmatprep.subr.mxu0 %v493_v1  ;;  %412 = vmatprep.subr.mxu1 %v493_v1  ;;  %v196_v46 = vld [vmem:[%s728_s3 + $0x18] sm:$0xff]  ;;  %v195_v47 = vld [vmem:[%s728_s3 + $0x10] sm:$0xff]  ;;  %v194_v51 = vld [vmem:[%s728_s3 + $0x8] sm:$0xff] }
  0x18   :  { %382 = vmatpush3.msra.mxu0 %v23_v21  ;;  %413 = vmatpush3.msra.mxu1 %v112_v22  ;;  %v193_v52 = vld [vmem:[%s728_s3] sm:$0xff]  ;;  %s495_s3 = smov [#allocation2]  }
  0x19   :  { %383 = vmatprep.subr.mxu0 %v493_v1  ;;  %414 = vmatprep.subr.mxu1 %v493_v1  ;;  %s300_s30 = sshll.u32 %s495_s3, 4  ;;  %s301_s30 = int_to_ptr.vmem [resolvable:$true] %s300_s30 }
  0x1a   :  { %384 = vmatpush3.msra.mxu0 %v22_v23  ;;  %415 = vmatpush3.msra.mxu1 %v111_v24  ;;  %s471_s5 = scalar_lea.vmem %s301_s30, 128  ;;  %p476_p1 = scmp.lt.s32.totalorder %s301_s30, %s301_s30 }
  0x1b   :  { %385 = vmatprep.subr.mxu0 %v493_v1  ;;  %416 = vmatprep.subr.mxu1 %v493_v1  ;;  %p472_p0 = scmp.ne.s32.totalorder %s301_s30, %s471_s5  ;;  %p477_p2 = scmp.lt.s32.totalorder %s471_s5, %s471_s5 }
  0x1c   :  { %386 = vmatpush3.msra.mxu0 %v21_v25  ;;  %417 = vmatpush3.msra.mxu1 %v110_v26 }
  0x1d   :  { %387 = vmatprep.subr.mxu0 %v493_v1  ;;  %418 = vmatprep.subr.mxu1 %v493_v1  ;;  %p478_p3 = por %p477_p2, %p476_p1 }
  0x1e   :  { %388 = vmatpush3.msra.mxu0 %v20_v27  ;;  %419 = vmatpush3.msra.mxu1 %v109_v28 }
  0x1f   :  { %389 = vmatprep.subr.mxu0 %v493_v1  ;;  %420 = vmatprep.subr.mxu1 %v493_v1  ;;  %p479_p4 = pnand %p478_p3, %p472_p0 }
  0x20   :  { %390 = vmatpush3.msra.mxu0 %v19_v29  ;;  %421 = vmatpush3.msra.mxu1 %v108_v30 }
  0x21   :  { %392 = vmatmul.mubr.f32.vlgmr.msra.gmra.mxu0 %v18_v31  ;;  %422 = vmatprep.subr.mxu1 %v493_v1 }
  0x22   :  { %429 = vmatprep.subr.mxu0 %v493_v1  ;;  %461 = vmatprep.mubr.msk.f32.mxu0 %vm494_vm0, %v493_v1 }
  0x23   :  { %423 = vmatpush3.msra.mxu1 %v107_v32  ;;  %430 = vmatpush3.msra.mxu0 %v208_v34 }
  0x24   :  { %424 = vmatprep.subr.mxu1 %v493_v1  ;;  %431 = vmatprep.subr.mxu0 %v493_v1 }
  0x25   :  { %425 = vmatpush3.msra.mxu1 %v106_v33  ;;  %432 = vmatpush3.msra.mxu0 %v207_v35 }
  0x26   :  { %433 = vmatprep.subr.mxu0 %v493_v1 }
  0x27   :  { %434 = vmatpush3.msra.mxu0 %v206_v36 }
  0x28   :  { %435 = vmatprep.subr.mxu0 %v493_v1 }
  0x29   :  { %436 = vmatpush3.msra.mxu0 %v205_v37 }
  0x2a   :  { %437 = vmatprep.subr.mxu0 %v493_v1 }
  0x2b   :  { %438 = vmatpush3.msra.mxu0 %v204_v38 }
  0x2c   :  { %439 = vmatprep.subr.mxu0 %v493_v1 }
  0x2d   :  { %440 = vmatpush3.msra.mxu0 %v203_v39 }
  0x2e   :  { %441 = vmatprep.subr.mxu0 %v493_v1 }
  0x2f   :  { %442 = vmatpush3.msra.mxu0 %v202_v40 }
  0x30   :  { %443 = vmatprep.subr.mxu0 %v493_v1 }
  0x31   :  { %444 = vmatpush3.msra.mxu0 %v201_v41 }
  0x32   :  { %445 = vmatprep.subr.mxu0 %v493_v1 }
  0x33   :  { %446 = vmatpush3.msra.mxu0 %v200_v42 }
  0x34   :  { %447 = vmatprep.subr.mxu0 %v493_v1 }
  0x35   :  { %448 = vmatpush3.msra.mxu0 %v199_v43 }
  0x36   :  { %449 = vmatprep.subr.mxu0 %v493_v1 }
  0x37   :  { %450 = vmatpush3.msra.mxu0 %v198_v44 }
  0x38   :  { %451 = vmatprep.subr.mxu0 %v493_v1 }
  0x39   :  { %452 = vmatpush3.msra.mxu0 %v197_v45 }
  0x3a   :  { %453 = vmatprep.subr.mxu0 %v493_v1 }
  0x3b   :  { %454 = vmatpush3.msra.mxu0 %v196_v46 }
  0x3c   :  { %455 = vmatprep.subr.mxu0 %v493_v1 }
  0x3d   :  { %456 = vmatpush3.msra.mxu0 %v195_v47 }
  0x3e   :  { %457 = vmatprep.subr.mxu0 %v493_v1 }
  0x3f   :  { %458 = vmatpush3.msra.mxu0 %v194_v51 }
  0x40   :  { %459 = vmatprep.subr.mxu0 %v493_v1 }
  0x41   :  { %460 = vmatpush3.msra.mxu0 %v193_v52 }
  0xe1   :  { %v101_v48 = vpop.f32.mrf.mxu0 }
  0xe2   :  { %v105_v49 = vmax.f32 %v101_v48, 0.0 }
  0xe3   :  { %v393_v50 = vpop.f32.mrf.mxu0 }
  0xe4   :  { %427 = vmatmul.mubr.f32.vlgmr.msra.gmra.mxu1 %v105_v49 }
 0x1a4   :  { %v188_v53 = vpop.f32.mrf.mxu1 }
 0x1a5   :  { %v192_v54 = vmax.f32 %v188_v53, 0.0 }
 0x1a6   :  { %v428_v55 = vpop.f32.mrf.mxu1 }
 0x1a7   :  { %462 = vmatmul.mubr.f32.vlgmr.msra.gmra.mxu0 %v192_v54 }
 0x267   :  { %v275_v58 = vpop.f32.mrf.mxu0 }
 0x268   :  { %v282_v59 = vsel %vm281_vm1, %v275_v58, -inf }
 0x269   :  { %283 = vmax.xlane.f32.xlu0 %v282_v59  ;;  %v463_v60 = vpop.f32.mrf.mxu0 }
 0x2f2   :  { %v284_v61 = vpop.xlane.xlu0 %283 }
 0x2f3   :  { %v285_v62 = vsub.f32 %v282_v59, %v284_v61 }
 0x2f5   :  { %v286_v63 = vmul.f32 1.442695, %v285_v62 }
 0x2f7   :  { %467 = vpow2.f32 %v286_v63 }
 0x304   :  { %v468_v0 = vpop.eup %467 }
 0x305   :  { %288 = vadd.xlane.f32.xlu0 %v468_v0 }
 0x38e   :  { %v289_v1 = vpop.xlane.xlu0 %288 }
 0x38f   :  { %469 = vlog2.f32 %v289_v1 }
 0x39c   :  { %v470_v2 = vpop.eup %469 }
 0x39d   :  { %v291_v3 = vmul.f32 0.6931472, %v470_v2 }
 0x39f   :  { %v292_v4 = vsub.f32 %v285_v62, %v291_v3 }
 0x3a1   :  { %293 = vst [vmem:[#allocation2] sm:$0xff] %v292_v4 }
 0x3a2   :  { %482 = shalt.err (!%p479_p4)
}
 0x3a3   :  { %303 = dma.vmem_to_hbm [thread:$0]  %s301_s30, 128, %s729_s4, [#allocation3]  }
 0x3a4   :  { %491 = dma.done.wait [#allocation3], 128  }
 0x3a5   :  { %492 = vsyncadd [#allocation3], 4294967168 }
 0x3a6   :  { %307 = vsyncpa [#allocation3], 1 }

</bundles_post_ra>
